<compile_context>
chip_gen: v7x
topology: tpu7x:2x2x1
jax: 0.10.0
libtpu: 0.0.40
codegen_flags: <defaults>
</compile_context>

<pallas_src>
import jax
import jax.numpy as jnp
from jax.experimental import pallas as pl
from jax.experimental.pallas import tpu as pltpu


_G = 128  # (H*W)-planes packed per lane group -> LANE = 128*H*W (multiple of 128)


def _bcast_mul_kernel(x_ref, w_ref, o_ref):
    # x_ref: (TR, LANE); w_ref: (1, LANE), resident across the grid.
    # The sublane broadcast of the weight row runs on the VPU and is hidden
    # under the HBM-bandwidth bound.
    o_ref[...] = x_ref[...] * w_ref[...]


def _round_up(a: int, b: int) -> int:
    return ((a + b - 1) // b) * b


def _sublane_multiple(dtype) -> int:
    # (8,128) vreg tile for 4-byte dtypes; sub-32-bit dtypes pack along sublanes.
    return max(8 * (4 // jnp.dtype(dtype).itemsize), 8)


def _default_block_rows() -> int:
    # v6e/v7x: 1024-row f32 block = 4.5 MiB; double-buffered x+out ~18 MiB fits
    # the 32 MiB scoped-VMEM default.  v5e (16 MiB scoped default) / unknown: 512.
    try:
        kind = jax.devices()[0].device_kind.lower()
    except Exception:
        return 512
    if "v6" in kind or "v7" in kind:
        return 1024
    return 512


def custom_module_forward(x: jax.Array, weight: jax.Array, *,
                          block_rows: int | None = None,
                          use_pallas: bool = True) -> jax.Array:
    """Pallas equivalent of CustomModule.forward: x * weight (weight broadcasts over N, C)."""
    # Torch-style promotion (e.g. bf16 * f32 -> f32).
    out_dtype = jnp.promote_types(x.dtype, weight.dtype)
    x = x.astype(out_dtype)
    weight = weight.astype(out_dtype)

    # TODO(synk): broadcast patterns other than weight=(1,1,H,W) with matching
    # spatial dims fall back to the (fusable) XLA elementwise multiply.
    if (not use_pallas or x.ndim != 4 or weight.shape[:2] != (1, 1)
            or x.shape[-2:] != weight.shape[-2:]):
        return x * weight

    n, c, h, w = x.shape
    P = h * w                     # weight values per (H, W) plane
    LANE = _G * P                 # 1152 for 3x3 -> unmasked lane-dense stores
    M = n * c                     # planes the weight broadcasts over
    rows = M // _G                # full lane-dense rows available with zero copies

    # Below one full lane-dense row the pallas_call is pure launch/DMA overhead.
    if rows == 0:
        return x * weight

    sub = _sublane_multiple(out_dtype)
    if block_rows is None:
        block_rows = _default_block_rows()
    block_rows = max(_round_up(block_rows, sub), sub)

    # Grid shaping: >= ~8 steps for medium/large inputs (pipelining + dual-TC),
    # block capped at block_rows, dtype-aware sublane rounding.
    min_steps = 8
    if rows <= sub:
        tr = rows                                             # one tiny full-dim block
    elif rows <= min_steps * sub:
        tr = sub
    else:
        tr = min(_round_up(pl.cdiv(rows, min_steps), sub), block_rows)
    grid = pl.cdiv(rows, tr)       # partial last block is masked by Pallas (elementwise-safe)

    # Zero-copy repack of the main body; only the (< LANE)-element tail (when
    # M % 128 != 0) is handled outside the kernel.
    x_flat = x.reshape(-1)
    main_len = rows * LANE
    if main_len == x_flat.size:
        x_main = x_flat.reshape(rows, LANE)
    else:
        x_main = x_flat[:main_len].reshape(rows, LANE)

    # Weight tiled once to one lane-dense row: w_row[0, g*P + p] == weight[p].
    w_row = jnp.tile(weight.reshape(1, P), (1, _G))

    out_main = pl.pallas_call(
        _bcast_mul_kernel,
        out_shape=jax.ShapeDtypeStruct((rows, LANE), out_dtype),
        grid=(grid,),
        in_specs=[
            pl.BlockSpec((tr, LANE), lambda i: (i, 0)),
            pl.BlockSpec((1, LANE), lambda i: (0, 0)),   # same block every step -> no re-DMA
        ],
        out_specs=pl.BlockSpec((tr, LANE), lambda i: (i, 0)),
        compiler_params=pltpu.CompilerParams(
            dimension_semantics=("parallel",),
        ),
    )(x_main, w_row)

    if main_len == x_flat.size:
        return out_main.reshape(n, c, h, w)

    # <= (128-1)*H*W element tail: fused XLA multiply, stitched back on.
    tail = x_flat[main_len:].reshape(-1, P) * weight.reshape(1, P)
    out_flat = jnp.concatenate([out_main.reshape(-1), tail.reshape(-1)])
    return out_flat.reshape(n, c, h, w)


if __name__ == "__main__":
    key = jax.random.PRNGKey(0)
    kx0, kx1, kx2, kx3, kx4, kw = jax.random.split(key, 6)

    # Deterministic stand-in for the lazily-initialized nn.Parameter(randn(1,1,3,3)).
    weight = jax.random.normal(kw, (1, 1, 3, 3), dtype=jnp.float32)

    # 1) The spec's input shape: tiny -> fused jnp path (no Pallas launch overhead).
    x_spec = jax.random.normal(kx0, (1, 1, 3, 3), dtype=jnp.float32)
    out_spec = custom_module_forward(x_spec, weight)
    jax.block_until_ready(out_spec)
    assert jnp.allclose(out_spec, x_spec * weight, atol=1e-6, rtol=1e-6)

    # 2) M = 64*64 = 4096 planes (multiple of 128): zero-copy Pallas path,
    #    4-step "parallel" grid (pipelined, dual-TC shardable), no pad / slice.
    x_a = jax.random.normal(kx1, (64, 64, 3, 3), dtype=jnp.float32)
    out_a = custom_module_forward(x_a, weight)
    jax.block_until_ready(out_a)
    assert jnp.allclose(out_a, x_a * weight, atol=1e-6, rtol=1e-6)

    # 3) M = 40*64 = 2560 -> rows=20, TR=8, grid=3: masked partial last block,
    #    still no padding or output slicing.
    x_b = jax.random.normal(kx2, (40, 64, 3, 3), dtype=jnp.float32)
    out_b = custom_module_forward(x_b, weight)
    jax.block_until_ready(out_b)
    assert jnp.allclose(out_b, x_b * weight, atol=1e-6, rtol=1e-6)

    # 4) M = 6*30 = 180 (not a multiple of 128): Pallas handles the 128-plane main
    #    row, the 52-plane tail goes through the fused jnp multiply.
    x_c = jax.random.normal(kx3, (6, 30, 3, 3), dtype=jnp.float32)
    out_c = custom_module_forward(x_c, weight)
    jax.block_until_ready(out_c)
    assert jnp.allclose(out_c, x_c * weight, atol=1e-6, rtol=1e-6)

    # 5) bf16 x * bf16 weight: dtype-aware sublane rounding (TR=16 -> (16,128) tile).
    x_d = jax.random.normal(kx4, (64, 64, 3, 3), dtype=jnp.bfloat16)
    w_bf = weight.astype(jnp.bfloat16)
    out_d = custom_module_forward(x_d, w_bf)
    jax.block_until_ready(out_d)
    assert jnp.allclose(out_d.astype(jnp.float32), (x_d * w_bf).astype(jnp.float32),
                        atol=1e-2, rtol=1e-2)

    print("KERNEL_OK")
</pallas_src>

<mosaic_0001>
module attributes {stable_mosaic.version = 11 : i64} {
  func.func @_bcast_mul_kernel(%arg0: i32, %arg1: memref<8x1152xf32, #tpu.memory_space<vmem>>, %arg2: memref<1x1152xf32, #tpu.memory_space<vmem>>, %arg3: memref<8x1152xf32, #tpu.memory_space<vmem>>) attributes {dimension_semantics = [#tpu.dimension_semantics<parallel>], iteration_bounds = array<i64: 4>, scalar_prefetch = 0 : i64, scratch_operands = 0 : i64, tpu.core_type = #tpu.core_type<tc>, window_params = [{transform_indices = @transform_0, window_bounds = array<i64: 8, 1152>}, {pipeline_mode = #tpu.pipeline_mode<synchronous>, transform_indices = @transform_1, window_bounds = array<i64: 1, 1152>}, {transform_indices = @transform_2, window_bounds = array<i64: 8, 1152>}]} {
    %c0 = arith.constant 0 : index
    %c0_0 = arith.constant 0 : index
    %0 = vector.load %arg1[%c0, %c0_0] : memref<8x1152xf32, #tpu.memory_space<vmem>>, vector<8x1152xf32>
    %c0_1 = arith.constant 0 : index
    %c0_2 = arith.constant 0 : index
    %1 = vector.load %arg2[%c0_1, %c0_2] : memref<1x1152xf32, #tpu.memory_space<vmem>>, vector<1x1152xf32>
    %2 = vector.broadcast %1 : vector<1x1152xf32> to vector<8x1152xf32>
    %3 = arith.mulf %0, %2 : vector<8x1152xf32>
    %c0_3 = arith.constant 0 : index
    %c0_4 = arith.constant 0 : index
    %4 = vector.load %arg3[%c0_3, %c0_4] : memref<8x1152xf32, #tpu.memory_space<vmem>>, vector<8x1152xf32>
    tpu.vector_store %arg3[%c0_3, %c0_4], %3 {strides = array<i32>} : memref<8x1152xf32, #tpu.memory_space<vmem>>, vector<8x1152xf32>,
    return
  }
  func.func @transform_0(%arg0: i32) -> (i32, i32) {
    %c0_i32 = arith.constant 0 : i32
    %c0_i32_0 = arith.constant 0 : i32
    return %arg0, %c0_i32 : i32, i32
  }
  func.func @transform_1(%arg0: i32) -> (i32, i32) {
    %c0_i32 = arith.constant 0 : i32
    %c0_i32_0 = arith.constant 0 : i32
    %c0_i32_1 = arith.constant 0 : i32
    return %c0_i32, %c0_i32_0 : i32, i32
  }
  func.func @transform_2(%arg0: i32) -> (i32, i32) {
    %c0_i32 = arith.constant 0 : i32
    %c0_i32_0 = arith.constant 0 : i32
    return %arg0, %c0_i32 : i32, i32
  }
}

</mosaic_0001>

<bundles_post_ra>
// kernel: tpu_custom_call.1
= control target key start
LH: loop header
LB: loop body
LE: loop exit
PB: predicated region body
PF: predicated region fallthrough
CT: control target
= control target key end

     0   :  { %7 = vsyncpa [#allocation3], 0  ;;  %s778_s0 = inlined_call_operand.hbm [shape: f32[32,1152], index: 0, kind: input, shape index: {}]   ;;  %s779_s1 = inlined_call_operand.hbm [shape: f32[1,1152], index: 1, kind: input, shape index: {}]   ;;  %s780_s2 = inlined_call_operand.hbm [shape: f32[32,1152], index: 2, kind: output, shape index: {}]  }
   0x1   :  { %9 = vsyncpa [#allocation3 + $0x1], 0 }
   0x2   :  { %10 = vsyncpa [#allocation6], 0 }
   0x3   :  { %11 = vsyncpa [#allocation4], 0 }
   0x4   :  { %13 = vsyncpa [#allocation4 + $0x1], 0  ;;  %s564_s9 = smov 0   ;;  %s566_s10 = smov 0  }
   0x5   :  { %s568_s11 = smov 0   ;;  %s570_s12 = smov 0  }
   0x6 LB: > { %s585_s13 = sadd.s32 4294967295, %s544_s12   ;;  %s344_s14 = sadd.s32 4294967294, %s544_s12   ;;  %s544_s12 = sphi %s570_s12, %s803_s12   ;;  %s540_s11 = sphi %s568_s11, %s802_s11   ;;  %s536_s10 = sphi %s566_s10, %s801_s10   ;;  %s532_s9 = sphi %s564_s9, %s800_s9  }
   0x7   : > { %p39_p0 = scmp.ne.s32.totalorder %s536_s10, %s532_s9  ;;  %p781_p1 = scmp.eq.s32.totalorder %s585_s13, 0 }
   0x8   : > { %p90_p3 = scmp.eq.s32.totalorder %s344_s14, 3  ;;  %p345_p5 = scmp.ge.s32.totalorder %s544_s12, 1 }
   0x9   : > { %p594_p4 = por %p781_p1, %p39_p0  ;;  %p97_p7 = scmp.lt.s32.totalorder %s544_s12, 5 }
   0xa   : > { %p599_p6 = por %p90_p3, %p39_p0  ;;  %s546_s18 = smov [#allocation5]  }
   0xb   : > { %s784_s15 = scalar_select %p594_p4, 1, 0 }
   0xc   : > { %s785_s16 = scalar_select %p599_p6, 1, 0 }
   0xd   : > { %p604_p8 = pnand %p345_p5, %p97_p7  ;;  %s110_s19 = sshll.u32 %s546_s18, 4  ;;  %s111_s19 = int_to_ptr.vmem [resolvable:$true] %s110_s19 }
   0xe   : > { %s611_s20 = sadd.s32 1, %s544_s12   ;;  %s26_s24 = sadd.s32 1, %s540_s11 }
   0xf   : > { %s786_s17 = scalar_select %p604_p8, 1, 0 }
  0x10   : > { %p367_p9 = pneg %p604_p8  ;;  %s23_s22 = ssub.s32 %s544_s12, %s611_s20 }
  0x11   : > { %p621_p11 = scmp.eq.s32.totalorder %s23_s22, 0  ;;  %s416_s27 = scalar_lea.hbm %s779_s1, 144 }
  0x12   : > { %p615_p10 = pnand %p367_p9, %p781_p1  ;;  %p417_p13 = scmp.ne.s32.totalorder %s779_s1, %s416_s27 }
  0x13   : > { %s788_s23 = scalar_select %p621_p11, 1, 0 }
  0x14   : > { %p418_p0 = pneg %p615_p10  ;;  %p423_p7 = scmp.lt.u32.totalorder %s416_s27, %s779_s1 }
  0x16   : > { %p419_p3 = pnand %p418_p0, %p417_p13 }
  0x18   : > { %p420_p5 = pneg %p419_p3 }
  0x1a   : > { %p425_p9 = pnand %p423_p7, %p420_p5 }
  0x1c   : > { %428 = shalt.err (!%p425_p9)
}
  0x1d   : > { %s429_s4 = scalar_lea.vmem %s111_s19, 144  ;;  %s436_s5 = scalar_lea.vmem %s111_s19, 160 }
  0x1e   : > { %p430_p1 = scmp.ne.s32.totalorder %s111_s19, %s429_s4  ;;  %p437_p6 = scmp.lt.s32.totalorder %s111_s19, %s111_s19 }
  0x1f   : > { %p438_p4 = scmp.lt.s32.totalorder %s436_s5, %s429_s4 }
  0x20   : > { %p432_p2 = pnand %p430_p1, %p418_p0 }
  0x21   : > { %p439_p8 = por %p438_p4, %p437_p6 }
  0x22   : > { %p433_p12 = pneg %p432_p2 }
  0x24   : > { %p440_p11 = pnand %p439_p8, %p433_p12 }
  0x26   : > { %443 = shalt.err (!%p440_p11)
}
  0x27   : > { %370 = dma.hbm_to_vmem [thread:$0]  (!%p615_p10), %s779_s1, 144, %s111_s19, [#allocation6]  }
  0x28   : > { %p789_p1 = scmp.ne.s32.totalorder %s788_s23, 0  ;;  %p34_p2 = scmp.eq.s32.totalorder %s544_s12, 0 }
  0x29   : > { %p790_p4 = scmp.ne.s32.totalorder %s540_s11, %s536_s10  ;;  %p791_p6 = scmp.eq.s32.totalorder %s585_s13, 3 }
  0x2a   : > { %s647_s8 = scalar_select %p789_p1, %s540_s11, %s26_s24  }
  0x2b   : > { %p655_p8 = por %p791_p6, %p790_p4  ;;  %p380_p11 = scmp.lt.s32.totalorder %s544_s12, 4 }
  0x2c   : > { %s121_s18 = sand.u32 1, %s540_s11   ;;  %p793_p12 = pmov %p790_p4 }
  0x2d   : > { %s355_s21 = smul.u32 72, %s121_s18  ;;  %s122_s28 = scalar_lea.sflag [#allocation3], %s121_s18 }
  0x2e   : > { %p35_p13 = por %p34_p2, %p793_p12  ;;  %s356_s22 = smul.u32 1152, %s544_s12 }
  0x2f   : > { %s125_s26 = scalar_lea.vmem [#allocation2], %s355_s21  ;;  %s449_s4 = scalar_lea.hbm %s778_s0, 4608 }
  0x30   : > { %p665_p0 = pnand %p380_p11, %p35_p13  ;;  %s672_s24 = scalar_lea.hbm %s778_s0, %s356_s22 }
  0x31   : > { %s133_s27 = sshll.u32 %s125_s26, 4  ;;  %s444_s29 = scalar_lea.hbm %s672_s24, 1152  ;;  %s674_s27 = int_to_ptr.vmem [resolvable:$true] %s133_s27 }
  0x32   : > { %p445_p10 = scmp.ne.s32.totalorder %s672_s24, %s444_s29  ;;  %p446_p3 = pneg %p665_p0 }
  0x33   : > { %p450_p9 = scmp.lt.u32.totalorder %s672_s24, %s778_s0  ;;  %p451_p1 = scmp.lt.u32.totalorder %s449_s4, %s444_s29 }
  0x34   : > { %p447_p5 = pnand %p446_p3, %p445_p10  ;;  %p453_p4 = scmp.lt.u32.totalorder %s444_s29, %s672_s24 }
  0x35   : > { %p452_p2 = por %p451_p1, %p450_p9 }
  0x36   : > { %p448_p7 = pneg %p447_p5 }
  0x37   : > { %p454_p6 = por %p453_p4, %p452_p2 }
  0x39   : > { %p455_p11 = pnand %p454_p6, %p448_p7 }
  0x3b   : > { %458 = shalt.err (!%p455_p11)
}
  0x3c   : > { %s459_s7 = scalar_lea.vmem %s674_s27, 1152  ;;  %s547_s18 = smov [#allocation2]  }
  0x3d   : > { %p460_p12 = scmp.ne.s32.totalorder %s674_s27, %s459_s7  ;;  %s464_s21 = sshll.u32 %s547_s18, 4  ;;  %s465_s21 = int_to_ptr.vmem [resolvable:$false] %s464_s21 }
  0x3e   : > { %s466_s22 = scalar_lea.vmem %s465_s21, 2304  ;;  %p467_p5 = scmp.lt.s32.totalorder %s674_s27, %s465_s21 }
  0x3f   : > { %p462_p13 = pnand %p460_p12, %p446_p3  ;;  %p468_p9 = scmp.lt.s32.totalorder %s466_s22, %s459_s7 }
  0x41   : > { %p463_p10 = pneg %p462_p13  ;;  %p469_p1 = por %p468_p9, %p467_p5 }
  0x43   : > { %p470_p2 = pnand %p469_p1, %p463_p10 }
  0x45   : > { %473 = shalt.err (!%p470_p2)
}
  0x46   : > { %374 = dma.hbm_to_vmem [thread:$0]  (!%p665_p0), %s672_s24, 1152, %s674_s27, %s122_s28  }
  0x47   : > { %p795_p7 = scmp.ne.s32.totalorder %s786_s17, 0 }
  0x48   : > { %s704_s19 = sand.u32 (!%p795_p7), 1, %s536_s10   ;;  %p796_p3 = scmp.ne.s32.totalorder (!%p795_p7), %s784_s15, 0 }
  0x49   : > { %142 = sbr.rel (%p795_p7) target bundleno = 112 (0x70), region = 28  ;;  %s145_s26 = scalar_lea.sflag (!%p795_p7), [#allocation3], %s704_s19 }
  0x4a   : > { %s357_s23 = smul.u32 (!%p795_p7), 72, %s704_s19 }
  0x4c   : > { %s710_s29 = scalar_lea.vmem (!%p795_p7), [#allocation2], %s357_s23 }
  0x50   : > { %519 = dma.done.wait (%p796_p3), %s145_s26, 1152  }
  0x51   : > { %521 = vsyncadd (%p796_p3), %s145_s26, 4294966144  ;;  %p797_p0 = scmp.eq.s32.totalorder %s585_s13, 0 }
  0x53   : > { %523 = dma.done.wait (%p797_p0), [#allocation6], 144   ;;  %p798_p4 = pmov %p797_p0 }
  0x54   : > { %v186_v0 = vlaneseq  ;;  %v173_v10 = vld [vmem:[%s710_s29] sm:$0xff]  ;;  %v182_v11 = vld [vmem:[#allocation5] sm:$0xff]  ;;  %v176_v17 = vld [vmem:[%s710_s29 + $0x18] sm:$0xff]  ;;  %s358_s15 = smul.u32 1152, %s585_s13  ;;  %s172_s17 = scalar_lea.vmem [#allocation7], %s357_s23 }
  0x55   : > { %525 = vsyncadd (%p798_p4), [#allocation6], 4294967152  ;;  %v174_v12 = vld [vmem:[%s710_s29 + $0x8] sm:$0xff]  ;;  %v175_v15 = vld [vmem:[%s710_s29 + $0x10] sm:$0xff]  ;;  %s264_s25 = sshll.u32 %s172_s17, 4  ;;  %s250_s28 = scalar_lea.sflag [#allocation4], %s704_s19  ;;  %s737_s25 = int_to_ptr.vmem [resolvable:$true] %s264_s25 }
  0x56   : > { %v187_v1 = vshrl.u32 %v186_v0, 7  ;;  %v177_v19 = vld [vmem:[%s710_s29 + $0x20] sm:$0xff]  ;;  %v178_v21 = vld [vmem:[%s710_s29 + $0x28] sm:$0xff]  ;;  %v179_v23 = vld [vmem:[%s710_s29 + $0x30] sm:$0xff]  ;;  %s735_s27 = scalar_lea.hbm %s780_s2, %s358_s15  ;;  %s474_s30 = scalar_lea.vmem %s737_s25, 1152 }
  0x57   : > { %v180_v25 = vld [vmem:[%s710_s29 + $0x38] sm:$0xff]  ;;  %v181_v31 = vld [vmem:[%s710_s29 + $0x40] sm:$0xff]  ;;  %p475_p6 = scmp.ne.s32.totalorder %s737_s25, %s474_s30  ;;  %s548_s3 = smov [#allocation7]  }
  0x58   : > { %v188_v2 = vsub.s32 0, %v187_v1  ;;  %v192_v3 = vsub.s32 1, %v187_v1  ;;  %v196_v4 = vsub.s32 2, %v187_v1  ;;  %v200_v5 = vsub.s32 3, %v187_v1  ;;  %v351_v32 = vld [vmem:[#allocation5 + $0x8] ss:$0 sm:$0xff] }
  0x59   : > { %v204_v6 = vsub.s32 4, %v187_v1  ;;  %v208_v7 = vsub.s32 5, %v187_v1  ;;  %v212_v8 = vsub.s32 6, %v187_v1  ;;  %v216_v9 = vsub.s32 7, %v187_v1  ;;  %p476_p11 = pnand %p475_p6, %p655_p8  ;;  %s478_s4 = sshll.u32 %s548_s3, 4  ;;  %s479_s4 = int_to_ptr.vmem [resolvable:$false] %s478_s4 }
  0x5a   : > { %v189_v13 = vrot.slane %v182_v11, %v188_v2  ;;  %v193_v14 = vrot.slane %v182_v11, %v192_v3  ;;  %v197_v16 = vrot.slane %v182_v11, %v196_v4  ;;  %v201_v18 = vrot.slane %v182_v11, %v200_v5  ;;  %s480_s5 = scalar_lea.vmem %s479_s4, 2304  ;;  %p481_p13 = scmp.lt.s32.totalorder %s737_s25, %s479_s4 }
  0x5b   : > { %v205_v20 = vrot.slane %v182_v11, %v204_v6  ;;  %v209_v22 = vrot.slane %v182_v11, %v208_v7  ;;  %v213_v24 = vrot.slane %v182_v11, %v212_v8  ;;  %v217_v26 = vrot.slane %v182_v11, %v216_v9  ;;  %p477_p12 = pneg %p476_p11  ;;  %p482_p10 = scmp.lt.s32.totalorder %s480_s5, %s474_s30 }
  0x5c   : > { %v231_v27 = vmul.f32 %v189_v13, %v173_v10  ;;  %v232_v28 = vmul.f32 %v193_v14, %v174_v12  ;;  %v233_v29 = vmul.f32 %v197_v16, %v175_v15  ;;  %v234_v30 = vmul.f32 %v201_v18, %v176_v17 }
  0x5d   : > { %v235_v33 = vmul.f32 %v205_v20, %v177_v19  ;;  %v236_v34 = vmul.f32 %v209_v22, %v178_v21  ;;  %v237_v35 = vmul.f32 %v213_v24, %v179_v23  ;;  %v238_v36 = vmul.f32 %v217_v26, %v180_v25  ;;  %p483_p5 = por %p482_p10, %p481_p13 }
  0x5e   : > { %240 = vst [vmem:[%s172_s17] sm:$0xff] %v231_v27  ;;  %241 = vst [vmem:[%s172_s17 + $0x8] sm:$0xff] %v232_v28  ;;  %v239_v37 = vmul.f32 %v351_v32, %v181_v31 }
  0x5f   : > { %242 = vst [vmem:[%s172_s17 + $0x10] sm:$0xff] %v233_v29  ;;  %243 = vst [vmem:[%s172_s17 + $0x18] sm:$0xff] %v234_v30  ;;  %p484_p9 = pnand %p483_p5, %p477_p12 }
  0x60   : > { %244 = vst [vmem:[%s172_s17 + $0x20] sm:$0xff] %v235_v33  ;;  %245 = vst [vmem:[%s172_s17 + $0x28] sm:$0xff] %v236_v34 }
  0x61   : > { %246 = vst [vmem:[%s172_s17 + $0x30] sm:$0xff] %v237_v35  ;;  %247 = vst [vmem:[%s172_s17 + $0x38] sm:$0xff] %v238_v36 }
  0x62   : > { %248 = vst [vmem:[%s172_s17 + $0x40] sm:$0xff] %v239_v37 }
  0x63   : > { %487 = shalt.err (!%p484_p9)
}
  0x64   : > { %s488_s6 = scalar_lea.hbm %s735_s27, 1152  ;;  %s492_s21 = scalar_lea.hbm %s780_s2, 4608 }
  0x65   : > { %p489_p1 = scmp.ne.s32.totalorder %s735_s27, %s488_s6  ;;  %p493_p3 = scmp.lt.u32.totalorder %s735_s27, %s780_s2 }
  0x66   : > { %p494_p0 = scmp.lt.u32.totalorder %s492_s21, %s488_s6  ;;  %p496_p6 = scmp.lt.u32.totalorder %s488_s6, %s735_s27 }
  0x67   : > { %p490_p2 = pnand %p489_p1, %p655_p8 }
  0x68   : > { %p495_p4 = por %p494_p0, %p493_p3 }
  0x69   : > { %p491_p7 = pneg %p490_p2 }
  0x6a   : > { %p497_p11 = por %p496_p6, %p495_p4 }
  0x6c   : > { %p498_p12 = pnand %p497_p11, %p491_p7 }
  0x6e   : > { %501 = shalt.err (!%p498_p12)
}
  0x6f   : > { %365 = dma.vmem_to_hbm [thread:$0]  (%p655_p8), %s737_s25, 1152, %s735_s27, %s250_s28  }
  0x70 PF: > { %p382_p13 = scmp.ge.s32.totalorder %s544_s12, 2  ;;  %s276_s23 = sand.u32 1, %s532_s9  }
  0x71   : > { %p799_p10 = scmp.ne.s32.totalorder %s785_s16, 0  ;;  %s277_s26 = scalar_lea.sflag [#allocation4], %s276_s23 }
  0x73   : > { %p376_p5 = pnand %p382_p13, %p799_p10 }
  0x75   : > { %527 = dma.done.wait (!%p376_p5), %s277_s26, 1152  }
  0x76   : > { %529 = vsyncadd (!%p376_p5), %s277_s26, 4294966144  ;;  %p16_p9 = scmp.ge.s32.totalorder %s611_s20, 6   ;;  %s800_s9 = smov %s536_s10 }
  0x77   : > { %s801_s10 = smov %s540_s11  ;;  %s802_s11 = smov %s647_s8 }
  0x78   : > { %s803_s12 = smov %s611_s20  ;;  %18 = sbr.rel (!%p16_p9) target bundleno = 6 (0x6), region = 77 }
  0x7f   :  { %282 = vsyncpa [#allocation3], 1 }
  0x80   :  { %284 = vsyncpa [#allocation3 + $0x1], 1 }
  0x81   :  { %285 = vsyncpa [#allocation6], 1 }
  0x82   :  { %286 = vsyncpa [#allocation4], 1 }
  0x83   :  { %288 = vsyncpa [#allocation4 + $0x1], 1 }

</bundles_post_ra>
